<compile_context>
chip_gen: v5e
topology: v5e:2x2
jax: 0.10.0
libtpu: 0.0.40
codegen_flags: <defaults>
</compile_context>

<pallas_src>
import functools

import jax
import jax.numpy as jnp
from jax import lax
from jax.experimental import pallas as pl
from jax.experimental.pallas import tpu as pltpu


def _round_up(x, m):
    return (x + m - 1) // m * m


# ----------------------------------------------------------------------------
# Pallas kernel: fused  out = act(A @ W + b)   (A, W bf16; f32 accumulate)
# ----------------------------------------------------------------------------
def _matmul_bias_act_kernel(a_ref, w_ref, b_ref, o_ref, *, act):
    acc = jnp.dot(a_ref[...], w_ref[...], preferred_element_type=jnp.float32)
    acc = acc + b_ref[...]                      # (1, Np) broadcasts over rows
    if act == "relu":
        acc = jnp.maximum(acc, 0.0)
    elif act == "tanh":
        acc = jnp.tanh(acc)
    elif act != "none":
        raise ValueError(f"unknown act {act}")
    o_ref[...] = acc.astype(o_ref.dtype)


def matmul_bias_act(a, w_p, b_p, act, tm_max=512):
    """a: (M, K) float; w_p: (Kp, Np) bf16 (zero-padded); b_p: (1, Np) f32.

    Kp, Np are multiples of 128 (lane-dense loads/stores). M is padded to a
    multiple of the row tile tm (itself a multiple of 16), so any M works.
    Returns act(a @ w + b) zero-padded to (Mp, Np) f32; caller slices [:M, :Cout].
    """
    M, K = a.shape
    Kp, Np = w_p.shape
    tm = min(tm_max, _round_up(M, 16))
    Mp = _round_up(M, tm)
    a_p = jnp.pad(a.astype(jnp.bfloat16), ((0, Mp - M), (0, Kp - K)))

    kernel = functools.partial(_matmul_bias_act_kernel, act=act)
    return pl.pallas_call(
        kernel,
        out_shape=jax.ShapeDtypeStruct((Mp, Np), jnp.float32),
        grid=(Mp // tm,),
        in_specs=[
            pl.BlockSpec((tm, Kp), lambda i: (i, 0)),
            pl.BlockSpec((Kp, Np), lambda i: (0, 0)),
            pl.BlockSpec((1, Np), lambda i: (0, 0)),
        ],
        out_specs=pl.BlockSpec((tm, Np), lambda i: (i, 0)),
        compiler_params=pltpu.CompilerParams(
            dimension_semantics=("parallel",),
            vmem_limit_bytes=32 * 1024 * 1024,   # tiles here are <~2 MiB; safe on v5e/v6e/v7x
        ),
    )(a_p, w_p, b_p)


# ----------------------------------------------------------------------------
# Conv3d(k=3, s=2, p=1) in channels-last: im2col glue + Pallas GEMM hot path
# ----------------------------------------------------------------------------
def conv3d_s2p1_cl(y, w_p, b_p, cout, act):
    """y: (N, D, H, W, C) f32 with even D/H/W.  w_p: (Kp, Np) bf16 whose first
    27*C rows / `cout` cols hold the real weights.  Returns (N,Do,Ho,Wo,cout) f32."""
    N, D, H, W, C = y.shape
    Do, Ho, Wo = D // 2, H // 2, W // 2
    xp = jnp.pad(y.astype(jnp.bfloat16), ((0, 0), (1, 1), (1, 1), (1, 1), (0, 0)))
    taps = [
        xp[:, kd:kd + 2 * Do:2, kh:kh + 2 * Ho:2, kw:kw + 2 * Wo:2, :]
        for kd in range(3) for kh in range(3) for kw in range(3)
    ]
    a = jnp.stack(taps, axis=-2).reshape(N * Do * Ho * Wo, 27 * C)   # bf16 im2col
    out = matmul_bias_act(a, w_p, b_p, act)                           # (Mp, Np) f32
    return out[: N * Do * Ho * Wo, :cout].reshape(N, Do, Ho, Wo, cout)


# ----------------------------------------------------------------------------
# Parameters (PyTorch layout) + one-time packing into Pallas-friendly layout
# ----------------------------------------------------------------------------
def init_encoder_params(key, in_channels, latent_dim, n_filters, patch_size):
    n = 16
    hidden_dim = int((patch_size // n) ** 3 * n_filters * 8)
    chans = [in_channels, n_filters, n_filters * 2, n_filters * 4, n_filters * 8]
    params = {"convs": [], "hidden_dim": hidden_dim}
    keys = jax.random.split(key, 5)
    for i in range(4):
        cin, cout = chans[i], chans[i + 1]
        bound = 1.0 / jnp.sqrt(cin * 27.0)
        kw_, kb_ = jax.random.split(keys[i])
        w = jax.random.uniform(kw_, (cout, cin, 3, 3, 3), jnp.float32, -bound, bound)
        b = jax.random.uniform(kb_, (cout,), jnp.float32, -bound, bound)
        params["convs"].append((w, b))
    kw_, kb_ = jax.random.split(keys[4])
    bound = 1.0 / jnp.sqrt(float(hidden_dim))
    params["lin_w"] = jax.random.uniform(
        kw_, (latent_dim, hidden_dim), jnp.float32, -bound, bound)
    params["lin_b"] = jax.random.uniform(
        kb_, (latent_dim,), jnp.float32, -bound, bound)
    return params


def prepare_pallas_params(params, n_filters, patch_size):
    """One-time packing: pre-transposed, K/N zero-padded to 128, bf16 weights."""
    prepared = {"convs": []}
    for (w, b) in params["convs"]:
        cout, cin = int(w.shape[0]), int(w.shape[1])
        k = 27 * cin
        kp, np_ = _round_up(k, 128), _round_up(cout, 128)
        w2 = jnp.transpose(w, (2, 3, 4, 1, 0)).reshape(k, cout)   # (kd,kh,kw,Cin) x Cout
        w2 = jnp.pad(w2, ((0, kp - k), (0, np_ - cout))).astype(jnp.bfloat16)
        b2 = jnp.pad(b, (0, np_ - cout)).reshape(1, np_).astype(jnp.float32)
        prepared["convs"].append((w2, b2, cout))
    # Linear: fold the NCDHW Flatten permutation into the weight, pre-transpose
    # to (hidden, latent), pad to lane-dense (Kp, Np), cast once to bf16.
    L, hidden = params["lin_w"].shape
    c8, df = n_filters * 8, patch_size // 16
    wl = params["lin_w"].reshape(L, c8, df, df, df)
    wl = jnp.transpose(wl, (2, 3, 4, 1, 0)).reshape(hidden, L)     # (d,h,w,c) ordering
    kp, np_ = _round_up(hidden, 128), _round_up(L, 128)
    prepared["lin_w"] = jnp.pad(wl, ((0, kp - hidden), (0, np_ - L))).astype(jnp.bfloat16)
    prepared["lin_b"] = jnp.pad(params["lin_b"], (0, np_ - L)).reshape(1, np_).astype(jnp.float32)
    return prepared


def make_encoder_forward(params, n_filters, patch_size, latent_dim):
    prepared = prepare_pallas_params(params, n_filters, patch_size)
    acts = ["relu", "relu", "relu", "tanh"]

    def forward(x):
        # x: (N, Cin, D, H, W) PyTorch NCDHW layout (even D/H/W).
        y = jnp.transpose(x, (0, 2, 3, 4, 1))               # channels-last, once
        for (w_p, b_p, cout), act in zip(prepared["convs"], acts):
            y = conv3d_s2p1_cl(y, w_p, b_p, cout, act)
        n = y.shape[0]
        a = y.reshape(n, -1)                                 # channels-last flatten
        out = matmul_bias_act(a, prepared["lin_w"], prepared["lin_b"], "tanh")
        return out[:n, :latent_dim]

    return jax.jit(forward)


# ----------------------------------------------------------------------------
# Pure-JAX reference (PyTorch semantics; bf16 matmul inputs to match precision)
# ----------------------------------------------------------------------------
def encoder_reference(params, x):
    acts = ["relu", "relu", "relu", "tanh"]
    y = x
    for (w, b), act in zip(params["convs"], acts):
        y = lax.conv_general_dilated(
            y.astype(jnp.bfloat16), w.astype(jnp.bfloat16),
            window_strides=(2, 2, 2), padding=((1, 1), (1, 1), (1, 1)),
            dimension_numbers=("NCDHW", "OIDHW", "NCDHW"),
            preferred_element_type=jnp.float32)
        y = y + b.reshape(1, -1, 1, 1, 1)
        y = jnp.maximum(y, 0.0) if act == "relu" else jnp.tanh(y)
    y = y.reshape(y.shape[0], -1)
    z = jnp.dot(y.astype(jnp.bfloat16), params["lin_w"].T.astype(jnp.bfloat16),
                preferred_element_type=jnp.float32) + params["lin_b"]
    return jnp.tanh(z)


if __name__ == "__main__":
    # Small shapes consistent with the module: patch_size=16, n_filters=4 ->
    # hidden_dim = (16/16)^3 * 32 = 32; latent_dim=8; batch=2; in_channels=1.
    batch, in_channels, patch_size = 2, 1, 16
    n_filters, latent_dim = 4, 8

    key = jax.random.PRNGKey(0)
    k_param, k_x = jax.random.split(key)
    params = init_encoder_params(k_param, in_channels, latent_dim, n_filters, patch_size)
    x = jax.random.normal(
        k_x, (batch, in_channels, patch_size, patch_size, patch_size), jnp.float32)

    forward = make_encoder_forward(params, n_filters, patch_size, latent_dim)
    out = jax.block_until_ready(forward(x))
    assert out.shape == (batch, latent_dim), out.shape

    ref = jax.block_until_ready(encoder_reference(params, x))
    max_err = float(jnp.max(jnp.abs(out - ref)))
    assert jnp.allclose(out, ref, atol=1e-2, rtol=1e-2), max_err

    print("KERNEL_OK")
</pallas_src>

<mosaic_0001>
module attributes {stable_mosaic.version = 11 : i64} {
  func.func @_matmul_bias_act_kernel(%arg0: i32, %arg1: memref<512x128xbf16, #tpu.memory_space<vmem>>, %arg2: memref<128x128xbf16, #tpu.memory_space<vmem>>, %arg3: memref<1x128xf32, #tpu.memory_space<vmem>>, %arg4: memref<512x128xf32, #tpu.memory_space<vmem>>) attributes {dimension_semantics = [#tpu.dimension_semantics<parallel>], iteration_bounds = array<i64: 2>, scalar_prefetch = 0 : i64, scratch_operands = 0 : i64, tpu.core_type = #tpu.core_type<tc>, window_params = [{transform_indices = @transform_0, window_bounds = array<i64: 512, 128>}, {pipeline_mode = #tpu.pipeline_mode<synchronous>, transform_indices = @transform_1, window_bounds = array<i64: 128, 128>}, {pipeline_mode = #tpu.pipeline_mode<synchronous>, transform_indices = @transform_2, window_bounds = array<i64: 1, 128>}, {transform_indices = @transform_3, window_bounds = array<i64: 512, 128>}]} {
    %c0 = arith.constant 0 : index
    %c0_0 = arith.constant 0 : index
    %0 = vector.load %arg1[%c0, %c0_0] : memref<512x128xbf16, #tpu.memory_space<vmem>>, vector<512x128xbf16>
    %c0_1 = arith.constant 0 : index
    %c0_2 = arith.constant 0 : index
    %1 = vector.load %arg2[%c0_1, %c0_2] : memref<128x128xbf16, #tpu.memory_space<vmem>>, vector<128x128xbf16>
    %cst = arith.constant dense<0.000000e+00> : vector<512x128xf32>
    %2 = tpu.matmul %0, %1, %cst {dimension_numbers = #tpu.dot_dimension_numbers<[1], [0], [0], [1], [0, 0, 1, 1], [], []>} : vector<512x128xbf16>, vector<128x128xbf16>, vector<512x128xf32> -> vector<512x128xf32>
    %c0_3 = arith.constant 0 : index
    %c0_4 = arith.constant 0 : index
    %3 = vector.load %arg3[%c0_3, %c0_4] : memref<1x128xf32, #tpu.memory_space<vmem>>, vector<1x128xf32>
    %4 = vector.broadcast %3 : vector<1x128xf32> to vector<512x128xf32>
    %5 = arith.addf %2, %4 : vector<512x128xf32>
    %cst_5 = arith.constant 0.000000e+00 : f32
    %6 = vector.broadcast %cst_5 : f32 to vector<512x128xf32>
    %7 = arith.maximumf %5, %6 : vector<512x128xf32>
    %c0_6 = arith.constant 0 : index
    %c0_7 = arith.constant 0 : index
    %8 = vector.load %arg4[%c0_6, %c0_7] : memref<512x128xf32, #tpu.memory_space<vmem>>, vector<512x128xf32>
    tpu.vector_store %arg4[%c0_6, %c0_7], %7 {strides = array<i32>} : memref<512x128xf32, #tpu.memory_space<vmem>>, vector<512x128xf32>,
    return
  }
  func.func @transform_0(%arg0: i32) -> (i32, i32) {
    %c0_i32 = arith.constant 0 : i32
    %c0_i32_0 = arith.constant 0 : i32
    return %arg0, %c0_i32 : i32, i32
  }
  func.func @transform_1(%arg0: i32) -> (i32, i32) {
    %c0_i32 = arith.constant 0 : i32
    %c0_i32_0 = arith.constant 0 : i32
    %c0_i32_1 = arith.constant 0 : i32
    return %c0_i32, %c0_i32_0 : i32, i32
  }
  func.func @transform_2(%arg0: i32) -> (i32, i32) {
    %c0_i32 = arith.constant 0 : i32
    %c0_i32_0 = arith.constant 0 : i32
    %c0_i32_1 = arith.constant 0 : i32
    return %c0_i32, %c0_i32_0 : i32, i32
  }
  func.func @transform_3(%arg0: i32) -> (i32, i32) {
    %c0_i32 = arith.constant 0 : i32
    %c0_i32_0 = arith.constant 0 : i32
    return %arg0, %c0_i32 : i32, i32
  }
}

module attributes {stable_mosaic.version = 11 : i64} {
  func.func @_matmul_bias_act_kernel(%arg0: i32, %arg1: memref<128x128xbf16, #tpu.memory_space<vmem>>, %arg2: memref<128x128xbf16, #tpu.memory_space<vmem>>, %arg3: memref<1x128xf32, #tpu.memory_space<vmem>>, %arg4: memref<128x128xf32, #tpu.memory_space<vmem>>) attributes {dimension_semantics = [#tpu.dimension_semantics<parallel>], iteration_bounds = array<i64: 1>, scalar_prefetch = 0 : i64, scratch_operands = 0 : i64, tpu.core_type = #tpu.core_type<tc>, window_params = [{transform_indices = @transform_0, window_bounds = array<i64: 128, 128>}, {pipeline_mode = #tpu.pipeline_mode<synchronous>, transform_indices = @transform_1, window_bounds = array<i64: 128, 128>}, {pipeline_mode = #tpu.pipeline_mode<synchronous>, transform_indices = @transform_2, window_bounds = array<i64: 1, 128>}, {transform_indices = @transform_3, window_bounds = array<i64: 128, 128>}]} {
    %c0 = arith.constant 0 : index
    %c0_0 = arith.constant 0 : index
    %0 = vector.load %arg1[%c0, %c0_0] : memref<128x128xbf16, #tpu.memory_space<vmem>>, vector<128x128xbf16>
    %c0_1 = arith.constant 0 : index
    %c0_2 = arith.constant 0 : index
    %1 = vector.load %arg2[%c0_1, %c0_2] : memref<128x128xbf16, #tpu.memory_space<vmem>>, vector<128x128xbf16>
    %cst = arith.constant dense<0.000000e+00> : vector<128x128xf32>
    %2 = tpu.matmul %0, %1, %cst {dimension_numbers = #tpu.dot_dimension_numbers<[1], [0], [0], [1], [0, 0, 1, 1], [], []>} : vector<128x128xbf16>, vector<128x128xbf16>, vector<128x128xf32> -> vector<128x128xf32>
    %c0_3 = arith.constant 0 : index
    %c0_4 = arith.constant 0 : index
    %3 = vector.load %arg3[%c0_3, %c0_4] : memref<1x128xf32, #tpu.memory_space<vmem>>, vector<1x128xf32>
    %4 = vector.broadcast %3 : vector<1x128xf32> to vector<128x128xf32>
    %5 = arith.addf %2, %4 : vector<128x128xf32>
    %cst_5 = arith.constant 0.000000e+00 : f32
    %6 = vector.broadcast %cst_5 : f32 to vector<128x128xf32>
    %7 = arith.maximumf %5, %6 : vector<128x128xf32>
    %c0_6 = arith.constant 0 : index
    %c0_7 = arith.constant 0 : index
    %8 = vector.load %arg4[%c0_6, %c0_7] : memref<128x128xf32, #tpu.memory_space<vmem>>, vector<128x128xf32>
    tpu.vector_store %arg4[%c0_6, %c0_7], %7 {strides = array<i32>} : memref<128x128xf32, #tpu.memory_space<vmem>>, vector<128x128xf32>,
    return
  }
  func.func @transform_0(%arg0: i32) -> (i32, i32) {
    %c0_i32 = arith.constant 0 : i32
    %c0_i32_0 = arith.constant 0 : i32
    return %arg0, %c0_i32 : i32, i32
  }
  func.func @transform_1(%arg0: i32) -> (i32, i32) {
    %c0_i32 = arith.constant 0 : i32
    %c0_i32_0 = arith.constant 0 : i32
    %c0_i32_1 = arith.constant 0 : i32
    return %c0_i32, %c0_i32_0 : i32, i32
  }
  func.func @transform_2(%arg0: i32) -> (i32, i32) {
    %c0_i32 = arith.constant 0 : i32
    %c0_i32_0 = arith.constant 0 : i32
    %c0_i32_1 = arith.constant 0 : i32
    return %c0_i32, %c0_i32_0 : i32, i32
  }
  func.func @transform_3(%arg0: i32) -> (i32, i32) {
    %c0_i32 = arith.constant 0 : i32
    %c0_i32_0 = arith.constant 0 : i32
    return %arg0, %c0_i32 : i32, i32
  }
}

module attributes {stable_mosaic.version = 11 : i64} {
  func.func @_matmul_bias_act_kernel(%arg0: i32, %arg1: memref<16x256xbf16, #tpu.memory_space<vmem>>, %arg2: memref<256x128xbf16, #tpu.memory_space<vmem>>, %arg3: memref<1x128xf32, #tpu.memory_space<vmem>>, %arg4: memref<16x128xf32, #tpu.memory_space<vmem>>) attributes {dimension_semantics = [#tpu.dimension_semantics<parallel>], iteration_bounds = array<i64: 1>, scalar_prefetch = 0 : i64, scratch_operands = 0 : i64, tpu.core_type = #tpu.core_type<tc>, window_params = [{transform_indices = @transform_0, window_bounds = array<i64: 16, 256>}, {pipeline_mode = #tpu.pipeline_mode<synchronous>, transform_indices = @transform_1, window_bounds = array<i64: 256, 128>}, {pipeline_mode = #tpu.pipeline_mode<synchronous>, transform_indices = @transform_2, window_bounds = array<i64: 1, 128>}, {transform_indices = @transform_3, window_bounds = array<i64: 16, 128>}]} {
    %c0 = arith.constant 0 : index
    %c0_0 = arith.constant 0 : index
    %0 = vector.load %arg1[%c0, %c0_0] : memref<16x256xbf16, #tpu.memory_space<vmem>>, vector<16x256xbf16>
    %c0_1 = arith.constant 0 : index
    %c0_2 = arith.constant 0 : index
    %1 = vector.load %arg2[%c0_1, %c0_2] : memref<256x128xbf16, #tpu.memory_space<vmem>>, vector<256x128xbf16>
    %cst = arith.constant dense<0.000000e+00> : vector<16x128xf32>
    %2 = tpu.matmul %0, %1, %cst {dimension_numbers = #tpu.dot_dimension_numbers<[1], [0], [0], [1], [0, 0, 1, 1], [], []>} : vector<16x256xbf16>, vector<256x128xbf16>, vector<16x128xf32> -> vector<16x128xf32>
    %c0_3 = arith.constant 0 : index
    %c0_4 = arith.constant 0 : index
    %3 = vector.load %arg3[%c0_3, %c0_4] : memref<1x128xf32, #tpu.memory_space<vmem>>, vector<1x128xf32>
    %4 = vector.broadcast %3 : vector<1x128xf32> to vector<16x128xf32>
    %5 = arith.addf %2, %4 : vector<16x128xf32>
    %cst_5 = arith.constant 0.000000e+00 : f32
    %6 = vector.broadcast %cst_5 : f32 to vector<16x128xf32>
    %7 = arith.maximumf %5, %6 : vector<16x128xf32>
    %c0_6 = arith.constant 0 : index
    %c0_7 = arith.constant 0 : index
    %8 = vector.load %arg4[%c0_6, %c0_7] : memref<16x128xf32, #tpu.memory_space<vmem>>, vector<16x128xf32>
    tpu.vector_store %arg4[%c0_6, %c0_7], %7 {strides = array<i32>} : memref<16x128xf32, #tpu.memory_space<vmem>>, vector<16x128xf32>,
    return
  }
  func.func @transform_0(%arg0: i32) -> (i32, i32) {
    %c0_i32 = arith.constant 0 : i32
    %c0_i32_0 = arith.constant 0 : i32
    return %arg0, %c0_i32 : i32, i32
  }
  func.func @transform_1(%arg0: i32) -> (i32, i32) {
    %c0_i32 = arith.constant 0 : i32
    %c0_i32_0 = arith.constant 0 : i32
    %c0_i32_1 = arith.constant 0 : i32
    return %c0_i32, %c0_i32_0 : i32, i32
  }
  func.func @transform_2(%arg0: i32) -> (i32, i32) {
    %c0_i32 = arith.constant 0 : i32
    %c0_i32_0 = arith.constant 0 : i32
    %c0_i32_1 = arith.constant 0 : i32
    return %c0_i32, %c0_i32_0 : i32, i32
  }
  func.func @transform_3(%arg0: i32) -> (i32, i32) {
    %c0_i32 = arith.constant 0 : i32
    %c0_i32_0 = arith.constant 0 : i32
    return %arg0, %c0_i32 : i32, i32
  }
}

module attributes {stable_mosaic.version = 11 : i64} {
  func.func @_matmul_bias_act_kernel(%arg0: i32, %arg1: memref<16x128xbf16, #tpu.memory_space<vmem>>, %arg2: memref<128x128xbf16, #tpu.memory_space<vmem>>, %arg3: memref<1x128xf32, #tpu.memory_space<vmem>>, %arg4: memref<16x128xf32, #tpu.memory_space<vmem>>) attributes {dimension_semantics = [#tpu.dimension_semantics<parallel>], iteration_bounds = array<i64: 1>, scalar_prefetch = 0 : i64, scratch_operands = 0 : i64, tpu.core_type = #tpu.core_type<tc>, window_params = [{transform_indices = @transform_0, window_bounds = array<i64: 16, 128>}, {pipeline_mode = #tpu.pipeline_mode<synchronous>, transform_indices = @transform_1, window_bounds = array<i64: 128, 128>}, {pipeline_mode = #tpu.pipeline_mode<synchronous>, transform_indices = @transform_2, window_bounds = array<i64: 1, 128>}, {transform_indices = @transform_3, window_bounds = array<i64: 16, 128>}]} {
    %c0 = arith.constant 0 : index
    %c0_0 = arith.constant 0 : index
    %0 = vector.load %arg1[%c0, %c0_0] : memref<16x128xbf16, #tpu.memory_space<vmem>>, vector<16x128xbf16>
    %c0_1 = arith.constant 0 : index
    %c0_2 = arith.constant 0 : index
    %1 = vector.load %arg2[%c0_1, %c0_2] : memref<128x128xbf16, #tpu.memory_space<vmem>>, vector<128x128xbf16>
    %cst = arith.constant dense<0.000000e+00> : vector<16x128xf32>
    %2 = tpu.matmul %0, %1, %cst {dimension_numbers = #tpu.dot_dimension_numbers<[1], [0], [0], [1], [0, 0, 1, 1], [], []>} : vector<16x128xbf16>, vector<128x128xbf16>, vector<16x128xf32> -> vector<16x128xf32>
    %c0_3 = arith.constant 0 : index
    %c0_4 = arith.constant 0 : index
    %3 = vector.load %arg3[%c0_3, %c0_4] : memref<1x128xf32, #tpu.memory_space<vmem>>, vector<1x128xf32>
    %4 = vector.broadcast %3 : vector<1x128xf32> to vector<16x128xf32>
    %5 = arith.addf %2, %4 : vector<16x128xf32>
    %6 = math.tanh %5 : vector<16x128xf32>
    %c0_5 = arith.constant 0 : index
    %c0_6 = arith.constant 0 : index
    %7 = vector.load %arg4[%c0_5, %c0_6] : memref<16x128xf32, #tpu.memory_space<vmem>>, vector<16x128xf32>
    tpu.vector_store %arg4[%c0_5, %c0_6], %6 {strides = array<i32>} : memref<16x128xf32, #tpu.memory_space<vmem>>, vector<16x128xf32>,
    return
  }
  func.func @transform_0(%arg0: i32) -> (i32, i32) {
    %c0_i32 = arith.constant 0 : i32
    %c0_i32_0 = arith.constant 0 : i32
    return %arg0, %c0_i32 : i32, i32
  }
  func.func @transform_1(%arg0: i32) -> (i32, i32) {
    %c0_i32 = arith.constant 0 : i32
    %c0_i32_0 = arith.constant 0 : i32
    %c0_i32_1 = arith.constant 0 : i32
    return %c0_i32, %c0_i32_0 : i32, i32
  }
  func.func @transform_2(%arg0: i32) -> (i32, i32) {
    %c0_i32 = arith.constant 0 : i32
    %c0_i32_0 = arith.constant 0 : i32
    %c0_i32_1 = arith.constant 0 : i32
    return %c0_i32, %c0_i32_0 : i32, i32
  }
  func.func @transform_3(%arg0: i32) -> (i32, i32) {
    %c0_i32 = arith.constant 0 : i32
    %c0_i32_0 = arith.constant 0 : i32
    return %arg0, %c0_i32 : i32, i32
  }
}

module attributes {stable_mosaic.version = 11 : i64} {
  func.func @_matmul_bias_act_kernel(%arg0: i32, %arg1: memref<16x512xbf16, #tpu.memory_space<vmem>>, %arg2: memref<512x128xbf16, #tpu.memory_space<vmem>>, %arg3: memref<1x128xf32, #tpu.memory_space<vmem>>, %arg4: memref<16x128xf32, #tpu.memory_space<vmem>>) attributes {dimension_semantics = [#tpu.dimension_semantics<parallel>], iteration_bounds = array<i64: 1>, scalar_prefetch = 0 : i64, scratch_operands = 0 : i64, tpu.core_type = #tpu.core_type<tc>, window_params = [{transform_indices = @transform_0, window_bounds = array<i64: 16, 512>}, {pipeline_mode = #tpu.pipeline_mode<synchronous>, transform_indices = @transform_1, window_bounds = array<i64: 512, 128>}, {pipeline_mode = #tpu.pipeline_mode<synchronous>, transform_indices = @transform_2, window_bounds = array<i64: 1, 128>}, {transform_indices = @transform_3, window_bounds = array<i64: 16, 128>}]} {
    %c0 = arith.constant 0 : index
    %c0_0 = arith.constant 0 : index
    %0 = vector.load %arg1[%c0, %c0_0] : memref<16x512xbf16, #tpu.memory_space<vmem>>, vector<16x512xbf16>
    %c0_1 = arith.constant 0 : index
    %c0_2 = arith.constant 0 : index
    %1 = vector.load %arg2[%c0_1, %c0_2] : memref<512x128xbf16, #tpu.memory_space<vmem>>, vector<512x128xbf16>
    %cst = arith.constant dense<0.000000e+00> : vector<16x128xf32>
    %2 = tpu.matmul %0, %1, %cst {dimension_numbers = #tpu.dot_dimension_numbers<[1], [0], [0], [1], [0, 0, 1, 1], [], []>} : vector<16x512xbf16>, vector<512x128xbf16>, vector<16x128xf32> -> vector<16x128xf32>
    %c0_3 = arith.constant 0 : index
    %c0_4 = arith.constant 0 : index
    %3 = vector.load %arg3[%c0_3, %c0_4] : memref<1x128xf32, #tpu.memory_space<vmem>>, vector<1x128xf32>
    %4 = vector.broadcast %3 : vector<1x128xf32> to vector<16x128xf32>
    %5 = arith.addf %2, %4 : vector<16x128xf32>
    %6 = math.tanh %5 : vector<16x128xf32>
    %c0_5 = arith.constant 0 : index
    %c0_6 = arith.constant 0 : index
    %7 = vector.load %arg4[%c0_5, %c0_6] : memref<16x128xf32, #tpu.memory_space<vmem>>, vector<16x128xf32>
    tpu.vector_store %arg4[%c0_5, %c0_6], %6 {strides = array<i32>} : memref<16x128xf32, #tpu.memory_space<vmem>>, vector<16x128xf32>,
    return
  }
  func.func @transform_0(%arg0: i32) -> (i32, i32) {
    %c0_i32 = arith.constant 0 : i32
    %c0_i32_0 = arith.constant 0 : i32
    return %arg0, %c0_i32 : i32, i32
  }
  func.func @transform_1(%arg0: i32) -> (i32, i32) {
    %c0_i32 = arith.constant 0 : i32
    %c0_i32_0 = arith.constant 0 : i32
    %c0_i32_1 = arith.constant 0 : i32
    return %c0_i32, %c0_i32_0 : i32, i32
  }
  func.func @transform_2(%arg0: i32) -> (i32, i32) {
    %c0_i32 = arith.constant 0 : i32
    %c0_i32_0 = arith.constant 0 : i32
    %c0_i32_1 = arith.constant 0 : i32
    return %c0_i32, %c0_i32_0 : i32, i32
  }
  func.func @transform_3(%arg0: i32) -> (i32, i32) {
    %c0_i32 = arith.constant 0 : i32
    %c0_i32_0 = arith.constant 0 : i32
    return %arg0, %c0_i32 : i32, i32
  }
}

</mosaic_0001>

<bundles_post_ra>
// kernel: forward.5
= control target key start
LH: loop header
LB: loop body
LE: loop exit
PB: predicated region body
PF: predicated region fallthrough
CT: control target
= control target key end

     0   :  { %s1123_s12 = smov 0   ;;  %s1337_s0 = inlined_call_operand.vmem [shape: bf16[1024,128], index: 0, kind: input, shape index: {}]   ;;  %s1338_s1 = inlined_call_operand.vmem [shape: bf16[128,128], index: 1, kind: input, shape index: {}]   ;;  %s1339_s2 = inlined_call_operand.vmem [shape: f32[1,128], index: 2, kind: input, shape index: {}]   ;;  %s1340_s3 = inlined_call_operand.vmem [shape: f32[1024,128], index: 3, kind: output, shape index: {}]  }
   0x1 LB: > { %s851_s13 = sadd.s32 4294967295, %s1101_s12   ;;  %p855_p0 = scmp.ge.s32.totalorder %s1101_s12, 1  ;;  %s1101_s12 = sphi %s1123_s12, %s13_s12  }
   0x2   : > { %p138_p1 = scmp.lt.s32.totalorder %s1101_s12, 3 }
   0x4   : > { %p139_p2 = pnand %p855_p0, %p138_p1 }
   0x5   : > { %s856_s22 = sshll.u32 (!%p139_p2), %s851_s13, 6 }
   0x6   : > { %142 = sbr.rel (%p139_p2) target bundleno = 302 (0x12e), region = 32  ;;  %p163_p3 = scmp.lt.s32.totalorder (!%p139_p2), %s856_s22, 127 }
   0xb   : > { %v1061_v0 = vld [vmem:[%s1338_s1 + $0x38] sm:$0xff]  ;;  %v1060_v1 = vld [vmem:[%s1338_s1 + $0x30] sm:$0xff]  ;;  %v1059_v2 = vld [vmem:[%s1338_s1 + $0x28] sm:$0xff]  ;;  %s1342_s22 = smov (!%p163_p3, %s856_s22), 127 }
   0xc   : > { %498 = vmatpush.bf16.msra.mxu0 %v1061_v0  ;;  %1062 = vmatpush.bf16.msra.mxu1 %v1061_v0  ;;  %v1058_v3 = vld [vmem:[%s1338_s1 + $0x20] sm:$0xff]  ;;  %v1057_v4 = vld [vmem:[%s1338_s1 + $0x18] sm:$0xff]  ;;  %v1056_v5 = vld [vmem:[%s1338_s1 + $0x10] sm:$0xff]  ;;  %s857_s29 = sshll.u32 %s1342_s22, 2  ;;  %s859_s10 = sshll.u32 %s1342_s22, 3 }
   0xd   : > { %1063 = vmatpush.bf16.msra.mxu2 %v1061_v0  ;;  %1064 = vmatpush.bf16.msra.mxu3 %v1061_v0  ;;  %v1055_v6 = vld [vmem:[%s1338_s1 + $0x8] sm:$0xff]  ;;  %v1054_v7 = vld [vmem:[%s1338_s1] sm:$0xff]  ;;  %s1161_s7 = scalar_lea.vmem %s1337_s0, %s857_s29  ;;  %s1206_s14 = scalar_lea.vmem %s1340_s3, %s859_s10 }
   0xe   : > { %v1022_v8 = vld [vmem:[%s1161_s7] sm:$0xff]  ;;  %v1023_v12 = vld [vmem:[%s1161_s7 + $0x8] sm:$0xff]  ;;  %v1024_v16 = vld [vmem:[%s1161_s7 + $0x10] sm:$0xff] }
   0xf   : > { %v1030_v9 = vld [vmem:[%s1161_s7 + $0x40] sm:$0xff]  ;;  %v1031_v13 = vld [vmem:[%s1161_s7 + $0x48] sm:$0xff]  ;;  %v1032_v17 = vld [vmem:[%s1161_s7 + $0x50] sm:$0xff] }
  0x10   : > { %499 = vmatpush.bf16.msra.mxu0 %v1060_v1  ;;  %1065 = vmatpush.bf16.msra.mxu1 %v1060_v1  ;;  %v1038_v10 = vld [vmem:[%s1161_s7 + $0x80] sm:$0xff]  ;;  %v1039_v14 = vld [vmem:[%s1161_s7 + $0x88] sm:$0xff]  ;;  %v1040_v18 = vld [vmem:[%s1161_s7 + $0x90] sm:$0xff] }
  0x11   : > { %1066 = vmatpush.bf16.msra.mxu2 %v1060_v1  ;;  %1067 = vmatpush.bf16.msra.mxu3 %v1060_v1  ;;  %v1046_v11 = vld [vmem:[%s1161_s7 + $0xc0] sm:$0xff]  ;;  %v1047_v15 = vld [vmem:[%s1161_s7 + $0xc8] sm:$0xff]  ;;  %v1048_v19 = vld [vmem:[%s1161_s7 + $0xd0] sm:$0xff] }
  0x12   : > { %v1025_v20 = vld [vmem:[%s1161_s7 + $0x18] sm:$0xff]  ;;  %v1026_v24 = vld [vmem:[%s1161_s7 + $0x20] sm:$0xff]  ;;  %v1027_v28 = vld [vmem:[%s1161_s7 + $0x28] sm:$0xff] }
  0x13   : > { %v1033_v21 = vld [vmem:[%s1161_s7 + $0x58] sm:$0xff]  ;;  %v1034_v25 = vld [vmem:[%s1161_s7 + $0x60] sm:$0xff]  ;;  %v1035_v29 = vld [vmem:[%s1161_s7 + $0x68] sm:$0xff] }
  0x14   : > { %500 = vmatpush.bf16.msra.mxu0 %v1059_v2  ;;  %1068 = vmatpush.bf16.msra.mxu1 %v1059_v2  ;;  %v1041_v22 = vld [vmem:[%s1161_s7 + $0x98] sm:$0xff]  ;;  %v1042_v26 = vld [vmem:[%s1161_s7 + $0xa0] sm:$0xff]  ;;  %v1043_v30 = vld [vmem:[%s1161_s7 + $0xa8] sm:$0xff] }
  0x15   : > { %1069 = vmatpush.bf16.msra.mxu2 %v1059_v2  ;;  %1070 = vmatpush.bf16.msra.mxu3 %v1059_v2  ;;  %v1049_v23 = vld [vmem:[%s1161_s7 + $0xd8] sm:$0xff]  ;;  %v1050_v27 = vld [vmem:[%s1161_s7 + $0xe0] sm:$0xff]  ;;  %v1051_v31 = vld [vmem:[%s1161_s7 + $0xe8] sm:$0xff] }
  0x16   : > { %v1028_v32 = vld [vmem:[%s1161_s7 + $0x30] sm:$0xff]  ;;  %v1029_v36 = vld [vmem:[%s1161_s7 + $0x38] sm:$0xff]  ;;  %v1198_v40 = vld [vmem:[%s1339_s2] ss:$0 sm:$0xff] }
  0x17   : > { %v1036_v33 = vld [vmem:[%s1161_s7 + $0x70] sm:$0xff]  ;;  %v1037_v37 = vld [vmem:[%s1161_s7 + $0x78] sm:$0xff] }
  0x18   : > { %501 = vmatpush.bf16.msra.mxu0 %v1058_v3  ;;  %1071 = vmatpush.bf16.msra.mxu1 %v1058_v3  ;;  %v1044_v34 = vld [vmem:[%s1161_s7 + $0xb0] sm:$0xff]  ;;  %v1045_v38 = vld [vmem:[%s1161_s7 + $0xb8] sm:$0xff] }
  0x19   : > { %1072 = vmatpush.bf16.msra.mxu2 %v1058_v3  ;;  %1073 = vmatpush.bf16.msra.mxu3 %v1058_v3  ;;  %v1052_v35 = vld [vmem:[%s1161_s7 + $0xf0] sm:$0xff]  ;;  %v1053_v39 = vld [vmem:[%s1161_s7 + $0xf8] sm:$0xff] }
  0x1c   : > { %502 = vmatpush.bf16.msra.mxu0 %v1057_v4  ;;  %1074 = vmatpush.bf16.msra.mxu1 %v1057_v4 }
  0x1d   : > { %1075 = vmatpush.bf16.msra.mxu2 %v1057_v4  ;;  %1076 = vmatpush.bf16.msra.mxu3 %v1057_v4 }
  0x20   : > { %503 = vmatpush.bf16.msra.mxu0 %v1056_v5  ;;  %1077 = vmatpush.bf16.msra.mxu1 %v1056_v5 }
  0x21   : > { %1078 = vmatpush.bf16.msra.mxu2 %v1056_v5  ;;  %1079 = vmatpush.bf16.msra.mxu3 %v1056_v5 }
  0x24   : > { %504 = vmatpush.bf16.msra.mxu0 %v1055_v6  ;;  %1080 = vmatpush.bf16.msra.mxu1 %v1055_v6 }
  0x25   : > { %1081 = vmatpush.bf16.msra.mxu2 %v1055_v6  ;;  %1082 = vmatpush.bf16.msra.mxu3 %v1055_v6 }
  0x28   : > { %505 = vmatpush.bf16.msra.mxu0 %v1054_v7  ;;  %1083 = vmatpush.bf16.msra.mxu1 %v1054_v7 }
  0x29   : > { %1084 = vmatpush.bf16.msra.mxu2 %v1054_v7  ;;  %1085 = vmatpush.bf16.msra.mxu3 %v1054_v7 }
  0x2b   : > { %506 = vmatmul.bf16.vlgmr.msra.gmra.mxu0 %v1022_v8  ;;  %546 = vmatmul.bf16.vlgmr.msra.gmra.mxu1 %v1030_v9 }
  0x2c   : > { %586 = vmatmul.bf16.vlgmr.msra.gmra.mxu2 %v1038_v10  ;;  %626 = vmatmul.bf16.vlgmr.msra.gmra.mxu3 %v1046_v11 }
  0x3b   : > { %511 = vmatmul.bf16.gmra.mxu0 %v1023_v12  ;;  %551 = vmatmul.bf16.gmra.mxu1 %v1031_v13 }
  0x3c   : > { %591 = vmatmul.bf16.gmra.mxu2 %v1039_v14  ;;  %631 = vmatmul.bf16.gmra.mxu3 %v1047_v15 }
  0x4b   : > { %516 = vmatmul.bf16.gmra.mxu0 %v1024_v16  ;;  %556 = vmatmul.bf16.gmra.mxu1 %v1032_v17 }
  0x4c   : > { %596 = vmatmul.bf16.gmra.mxu2 %v1040_v18  ;;  %636 = vmatmul.bf16.gmra.mxu3 %v1048_v19 }
  0x5b   : > { %521 = vmatmul.bf16.gmra.mxu0 %v1025_v20  ;;  %561 = vmatmul.bf16.gmra.mxu1 %v1033_v21 }
  0x5c   : > { %601 = vmatmul.bf16.gmra.mxu2 %v1041_v22  ;;  %641 = vmatmul.bf16.gmra.mxu3 %v1049_v23 }
  0x6b   : > { %526 = vmatmul.bf16.gmra.mxu0 %v1026_v24  ;;  %566 = vmatmul.bf16.gmra.mxu1 %v1034_v25 }
  0x6c   : > { %606 = vmatmul.bf16.gmra.mxu2 %v1042_v26  ;;  %646 = vmatmul.bf16.gmra.mxu3 %v1050_v27 }
  0x7b   : > { %531 = vmatmul.bf16.gmra.mxu0 %v1027_v28  ;;  %571 = vmatmul.bf16.gmra.mxu1 %v1035_v29 }
  0x7c   : > { %611 = vmatmul.bf16.gmra.mxu2 %v1043_v30  ;;  %651 = vmatmul.bf16.gmra.mxu3 %v1051_v31 }
  0x8b   : > { %536 = vmatmul.bf16.gmra.mxu0 %v1028_v32  ;;  %576 = vmatmul.bf16.gmra.mxu1 %v1036_v33 }
  0x8c   : > { %616 = vmatmul.bf16.gmra.mxu2 %v1044_v34  ;;  %656 = vmatmul.bf16.gmra.mxu3 %v1052_v35 }
  0x9b   : > { %541 = vmatmul.bf16.gmra.mxu0 %v1029_v36  ;;  %581 = vmatmul.bf16.gmra.mxu1 %v1037_v37 }
  0x9c   : > { %621 = vmatmul.bf16.gmra.mxu2 %v1045_v38  ;;  %661 = vmatmul.bf16.gmra.mxu3 %v1053_v39 }
  0xa8   : > { %v507_v41 = vpop.f32.mrf.mxu0  ;;  %v547_v42 = vpop.f32.mrf.mxu1 }
  0xa9   : > { %v508_v43 = vadd.f32 %v1198_v40, %v507_v41  ;;  %v548_v44 = vadd.f32 %v1198_v40, %v547_v42 }
  0xab   : > { %v667_v45 = vmax.f32 %v508_v43, 0.0  ;;  %v683_v46 = vmax.f32 %v548_v44, 0.0 }
  0xad   : > { %731 = vst [vmem:[%s1206_s14] sm:$0xff] %v667_v45 }
  0xae   : > { %747 = vst [vmem:[%s1206_s14 + $0x80] sm:$0xff] %v683_v46 }
  0xaf   : > { %v587_v47 = vpop.f32.mrf.mxu2  ;;  %v627_v48 = vpop.f32.mrf.mxu3 }
  0xb0   : > { %v588_v49 = vadd.f32 %v1198_v40, %v587_v47  ;;  %v628_v50 = vadd.f32 %v1198_v40, %v627_v48  ;;  %v509_v51 = vpop.f32.mrf.mxu0  ;;  %v549_v52 = vpop.f32.mrf.mxu1 }
  0xb1   : > { %v510_v53 = vadd.f32 %v1198_v40, %v509_v51  ;;  %v550_v54 = vadd.f32 %v1198_v40, %v549_v52 }
  0xb2   : > { %v699_v55 = vmax.f32 %v588_v49, 0.0  ;;  %v715_v56 = vmax.f32 %v628_v50, 0.0 }
  0xb3   : > { %v668_v57 = vmax.f32 %v510_v53, 0.0  ;;  %v684_v58 = vmax.f32 %v550_v54, 0.0 }
  0xb4   : > { %763 = vst [vmem:[%s1206_s14 + $0x100] sm:$0xff] %v699_v55 }
  0xb5   : > { %779 = vst [vmem:[%s1206_s14 + $0x180] sm:$0xff] %v715_v56 }
  0xb6   : > { %732 = vst [vmem:[%s1206_s14 + $0x8] sm:$0xff] %v668_v57 }
  0xb7   : > { %748 = vst [vmem:[%s1206_s14 + $0x88] sm:$0xff] %v684_v58  ;;  %v589_v59 = vpop.f32.mrf.mxu2  ;;  %v629_v60 = vpop.f32.mrf.mxu3 }
  0xb8   : > { %v590_v61 = vadd.f32 %v1198_v40, %v589_v59  ;;  %v630_v62 = vadd.f32 %v1198_v40, %v629_v60  ;;  %v512_v63 = vpop.f32.mrf.mxu0  ;;  %v552_v0 = vpop.f32.mrf.mxu1 }
  0xb9   : > { %v513_v1 = vadd.f32 %v1198_v40, %v512_v63  ;;  %v553_v2 = vadd.f32 %v1198_v40, %v552_v0 }
  0xba   : > { %v700_v3 = vmax.f32 %v590_v61, 0.0  ;;  %v716_v4 = vmax.f32 %v630_v62, 0.0 }
  0xbb   : > { %v669_v5 = vmax.f32 %v513_v1, 0.0  ;;  %v685_v6 = vmax.f32 %v553_v2, 0.0 }
  0xbc   : > { %764 = vst [vmem:[%s1206_s14 + $0x108] sm:$0xff] %v700_v3 }
  0xbd   : > { %780 = vst [vmem:[%s1206_s14 + $0x188] sm:$0xff] %v716_v4 }
  0xbe   : > { %733 = vst [vmem:[%s1206_s14 + $0x10] sm:$0xff] %v669_v5 }
  0xbf   : > { %749 = vst [vmem:[%s1206_s14 + $0x90] sm:$0xff] %v685_v6  ;;  %v592_v7 = vpop.f32.mrf.mxu2  ;;  %v632_v8 = vpop.f32.mrf.mxu3 }
  0xc0   : > { %v593_v9 = vadd.f32 %v1198_v40, %v592_v7  ;;  %v633_v10 = vadd.f32 %v1198_v40, %v632_v8  ;;  %v514_v11 = vpop.f32.mrf.mxu0  ;;  %v554_v12 = vpop.f32.mrf.mxu1 }
  0xc1   : > { %v515_v13 = vadd.f32 %v1198_v40, %v514_v11  ;;  %v555_v14 = vadd.f32 %v1198_v40, %v554_v12 }
  0xc2   : > { %v701_v15 = vmax.f32 %v593_v9, 0.0  ;;  %v717_v16 = vmax.f32 %v633_v10, 0.0 }
  0xc3   : > { %v670_v17 = vmax.f32 %v515_v13, 0.0  ;;  %v686_v18 = vmax.f32 %v555_v14, 0.0 }
  0xc4   : > { %765 = vst [vmem:[%s1206_s14 + $0x110] sm:$0xff] %v701_v15 }
  0xc5   : > { %781 = vst [vmem:[%s1206_s14 + $0x190] sm:$0xff] %v717_v16 }
  0xc6   : > { %734 = vst [vmem:[%s1206_s14 + $0x18] sm:$0xff] %v670_v17 }
  0xc7   : > { %750 = vst [vmem:[%s1206_s14 + $0x98] sm:$0xff] %v686_v18  ;;  %v594_v19 = vpop.f32.mrf.mxu2  ;;  %v634_v20 = vpop.f32.mrf.mxu3 }
  0xc8   : > { %v595_v21 = vadd.f32 %v1198_v40, %v594_v19  ;;  %v635_v22 = vadd.f32 %v1198_v40, %v634_v20  ;;  %v517_v23 = vpop.f32.mrf.mxu0  ;;  %v557_v24 = vpop.f32.mrf.mxu1 }
  0xc9   : > { %v518_v25 = vadd.f32 %v1198_v40, %v517_v23  ;;  %v558_v26 = vadd.f32 %v1198_v40, %v557_v24 }
  0xca   : > { %v702_v27 = vmax.f32 %v595_v21, 0.0  ;;  %v718_v28 = vmax.f32 %v635_v22, 0.0 }
  0xcb   : > { %v671_v29 = vmax.f32 %v518_v25, 0.0  ;;  %v687_v30 = vmax.f32 %v558_v26, 0.0 }
  0xcc   : > { %766 = vst [vmem:[%s1206_s14 + $0x118] sm:$0xff] %v702_v27 }
  0xcd   : > { %782 = vst [vmem:[%s1206_s14 + $0x198] sm:$0xff] %v718_v28 }
  0xce   : > { %735 = vst [vmem:[%s1206_s14 + $0x20] sm:$0xff] %v671_v29 }
  0xcf   : > { %751 = vst [vmem:[%s1206_s14 + $0xa0] sm:$0xff] %v687_v30  ;;  %v597_v31 = vpop.f32.mrf.mxu2  ;;  %v637_v32 = vpop.f32.mrf.mxu3 }
  0xd0   : > { %v598_v33 = vadd.f32 %v1198_v40, %v597_v31  ;;  %v638_v34 = vadd.f32 %v1198_v40, %v637_v32  ;;  %v519_v35 = vpop.f32.mrf.mxu0  ;;  %v559_v36 = vpop.f32.mrf.mxu1 }
  0xd1   : > { %v520_v37 = vadd.f32 %v1198_v40, %v519_v35  ;;  %v560_v38 = vadd.f32 %v1198_v40, %v559_v36 }
  0xd2   : > { %v703_v39 = vmax.f32 %v598_v33, 0.0  ;;  %v719_v41 = vmax.f32 %v638_v34, 0.0 }
  0xd3   : > { %v672_v42 = vmax.f32 %v520_v37, 0.0  ;;  %v688_v43 = vmax.f32 %v560_v38, 0.0 }
  0xd4   : > { %767 = vst [vmem:[%s1206_s14 + $0x120] sm:$0xff] %v703_v39 }
  0xd5   : > { %783 = vst [vmem:[%s1206_s14 + $0x1a0] sm:$0xff] %v719_v41 }
  0xd6   : > { %736 = vst [vmem:[%s1206_s14 + $0x28] sm:$0xff] %v672_v42 }
  0xd7   : > { %752 = vst [vmem:[%s1206_s14 + $0xa8] sm:$0xff] %v688_v43  ;;  %v599_v44 = vpop.f32.mrf.mxu2  ;;  %v639_v45 = vpop.f32.mrf.mxu3 }
  0xd8   : > { %v600_v46 = vadd.f32 %v1198_v40, %v599_v44  ;;  %v640_v47 = vadd.f32 %v1198_v40, %v639_v45  ;;  %v522_v48 = vpop.f32.mrf.mxu0  ;;  %v562_v49 = vpop.f32.mrf.mxu1 }
  0xd9   : > { %v523_v50 = vadd.f32 %v1198_v40, %v522_v48  ;;  %v563_v51 = vadd.f32 %v1198_v40, %v562_v49 }
  0xda   : > { %v704_v52 = vmax.f32 %v600_v46, 0.0  ;;  %v720_v53 = vmax.f32 %v640_v47, 0.0 }
  0xdb   : > { %v673_v54 = vmax.f32 %v523_v50, 0.0  ;;  %v689_v55 = vmax.f32 %v563_v51, 0.0 }
  0xdc   : > { %768 = vst [vmem:[%s1206_s14 + $0x128] sm:$0xff] %v704_v52 }
  0xdd   : > { %784 = vst [vmem:[%s1206_s14 + $0x1a8] sm:$0xff] %v720_v53 }
  0xde   : > { %737 = vst [vmem:[%s1206_s14 + $0x30] sm:$0xff] %v673_v54 }
  0xdf   : > { %753 = vst [vmem:[%s1206_s14 + $0xb0] sm:$0xff] %v689_v55  ;;  %v602_v56 = vpop.f32.mrf.mxu2  ;;  %v642_v57 = vpop.f32.mrf.mxu3 }
  0xe0   : > { %v603_v58 = vadd.f32 %v1198_v40, %v602_v56  ;;  %v643_v59 = vadd.f32 %v1198_v40, %v642_v57  ;;  %v524_v60 = vpop.f32.mrf.mxu0  ;;  %v564_v61 = vpop.f32.mrf.mxu1 }
  0xe1   : > { %v525_v62 = vadd.f32 %v1198_v40, %v524_v60  ;;  %v565_v63 = vadd.f32 %v1198_v40, %v564_v61 }
  0xe2   : > { %v705_v0 = vmax.f32 %v603_v58, 0.0  ;;  %v721_v1 = vmax.f32 %v643_v59, 0.0 }
  0xe3   : > { %v674_v2 = vmax.f32 %v525_v62, 0.0  ;;  %v690_v3 = vmax.f32 %v565_v63, 0.0 }
  0xe4   : > { %769 = vst [vmem:[%s1206_s14 + $0x130] sm:$0xff] %v705_v0 }
  0xe5   : > { %785 = vst [vmem:[%s1206_s14 + $0x1b0] sm:$0xff] %v721_v1 }
  0xe6   : > { %738 = vst [vmem:[%s1206_s14 + $0x38] sm:$0xff] %v674_v2 }
  0xe7   : > { %754 = vst [vmem:[%s1206_s14 + $0xb8] sm:$0xff] %v690_v3  ;;  %v604_v4 = vpop.f32.mrf.mxu2  ;;  %v644_v5 = vpop.f32.mrf.mxu3 }
  0xe8   : > { %v605_v6 = vadd.f32 %v1198_v40, %v604_v4  ;;  %v645_v7 = vadd.f32 %v1198_v40, %v644_v5  ;;  %v527_v8 = vpop.f32.mrf.mxu0  ;;  %v567_v9 = vpop.f32.mrf.mxu1 }
  0xe9   : > { %v528_v10 = vadd.f32 %v1198_v40, %v527_v8  ;;  %v568_v11 = vadd.f32 %v1198_v40, %v567_v9 }
  0xea   : > { %v706_v12 = vmax.f32 %v605_v6, 0.0  ;;  %v722_v13 = vmax.f32 %v645_v7, 0.0 }
  0xeb   : > { %v675_v14 = vmax.f32 %v528_v10, 0.0  ;;  %v691_v15 = vmax.f32 %v568_v11, 0.0 }
  0xec   : > { %770 = vst [vmem:[%s1206_s14 + $0x138] sm:$0xff] %v706_v12 }
  0xed   : > { %786 = vst [vmem:[%s1206_s14 + $0x1b8] sm:$0xff] %v722_v13 }
  0xee   : > { %739 = vst [vmem:[%s1206_s14 + $0x40] sm:$0xff] %v675_v14 }
  0xef   : > { %755 = vst [vmem:[%s1206_s14 + $0xc0] sm:$0xff] %v691_v15  ;;  %v607_v16 = vpop.f32.mrf.mxu2  ;;  %v647_v17 = vpop.f32.mrf.mxu3 }
  0xf0   : > { %v608_v18 = vadd.f32 %v1198_v40, %v607_v16  ;;  %v648_v19 = vadd.f32 %v1198_v40, %v647_v17  ;;  %v529_v20 = vpop.f32.mrf.mxu0  ;;  %v569_v21 = vpop.f32.mrf.mxu1 }
  0xf1   : > { %v530_v22 = vadd.f32 %v1198_v40, %v529_v20  ;;  %v570_v23 = vadd.f32 %v1198_v40, %v569_v21 }
  0xf2   : > { %v707_v24 = vmax.f32 %v608_v18, 0.0  ;;  %v723_v25 = vmax.f32 %v648_v19, 0.0 }
  0xf3   : > { %v676_v26 = vmax.f32 %v530_v22, 0.0  ;;  %v692_v27 = vmax.f32 %v570_v23, 0.0 }
  0xf4   : > { %771 = vst [vmem:[%s1206_s14 + $0x140] sm:$0xff] %v707_v24 }
  0xf5   : > { %787 = vst [vmem:[%s1206_s14 + $0x1c0] sm:$0xff] %v723_v25 }
  0xf6   : > { %740 = vst [vmem:[%s1206_s14 + $0x48] sm:$0xff] %v676_v26 }
  0xf7   : > { %756 = vst [vmem:[%s1206_s14 + $0xc8] sm:$0xff] %v692_v27  ;;  %v609_v28 = vpop.f32.mrf.mxu2  ;;  %v649_v29 = vpop.f32.mrf.mxu3 }
  0xf8   : > { %v610_v30 = vadd.f32 %v1198_v40, %v609_v28  ;;  %v650_v31 = vadd.f32 %v1198_v40, %v649_v29  ;;  %v532_v32 = vpop.f32.mrf.mxu0  ;;  %v572_v33 = vpop.f32.mrf.mxu1 }
  0xf9   : > { %v533_v34 = vadd.f32 %v1198_v40, %v532_v32  ;;  %v573_v35 = vadd.f32 %v1198_v40, %v572_v33 }
  0xfa   : > { %v708_v36 = vmax.f32 %v610_v30, 0.0  ;;  %v724_v37 = vmax.f32 %v650_v31, 0.0 }
  0xfb   : > { %v677_v38 = vmax.f32 %v533_v34, 0.0  ;;  %v693_v39 = vmax.f32 %v573_v35, 0.0 }
  0xfc   : > { %772 = vst [vmem:[%s1206_s14 + $0x148] sm:$0xff] %v708_v36 }
  0xfd   : > { %788 = vst [vmem:[%s1206_s14 + $0x1c8] sm:$0xff] %v724_v37 }
  0xfe   : > { %741 = vst [vmem:[%s1206_s14 + $0x50] sm:$0xff] %v677_v38 }
  0xff   : > { %757 = vst [vmem:[%s1206_s14 + $0xd0] sm:$0xff] %v693_v39  ;;  %v612_v41 = vpop.f32.mrf.mxu2  ;;  %v652_v42 = vpop.f32.mrf.mxu3 }
 0x100   : > { %v613_v43 = vadd.f32 %v1198_v40, %v612_v41  ;;  %v653_v44 = vadd.f32 %v1198_v40, %v652_v42  ;;  %v534_v45 = vpop.f32.mrf.mxu0  ;;  %v574_v46 = vpop.f32.mrf.mxu1 }
 0x101   : > { %v535_v47 = vadd.f32 %v1198_v40, %v534_v45  ;;  %v575_v48 = vadd.f32 %v1198_v40, %v574_v46 }
 0x102   : > { %v709_v49 = vmax.f32 %v613_v43, 0.0  ;;  %v725_v50 = vmax.f32 %v653_v44, 0.0 }
 0x103   : > { %v678_v51 = vmax.f32 %v535_v47, 0.0  ;;  %v694_v52 = vmax.f32 %v575_v48, 0.0 }
 0x104   : > { %773 = vst [vmem:[%s1206_s14 + $0x150] sm:$0xff] %v709_v49 }
 0x105   : > { %789 = vst [vmem:[%s1206_s14 + $0x1d0] sm:$0xff] %v725_v50 }
 0x106   : > { %742 = vst [vmem:[%s1206_s14 + $0x58] sm:$0xff] %v678_v51 }
 0x107   : > { %758 = vst [vmem:[%s1206_s14 + $0xd8] sm:$0xff] %v694_v52  ;;  %v614_v53 = vpop.f32.mrf.mxu2  ;;  %v654_v54 = vpop.f32.mrf.mxu3 }
 0x108   : > { %v615_v55 = vadd.f32 %v1198_v40, %v614_v53  ;;  %v655_v56 = vadd.f32 %v1198_v40, %v654_v54  ;;  %v537_v57 = vpop.f32.mrf.mxu0  ;;  %v577_v58 = vpop.f32.mrf.mxu1 }
 0x109   : > { %v538_v59 = vadd.f32 %v1198_v40, %v537_v57  ;;  %v578_v60 = vadd.f32 %v1198_v40, %v577_v58 }
 0x10a   : > { %v710_v61 = vmax.f32 %v615_v55, 0.0  ;;  %v726_v62 = vmax.f32 %v655_v56, 0.0 }
 0x10b   : > { %v679_v63 = vmax.f32 %v538_v59, 0.0  ;;  %v695_v0 = vmax.f32 %v578_v60, 0.0 }
 0x10c   : > { %774 = vst [vmem:[%s1206_s14 + $0x158] sm:$0xff] %v710_v61 }
 0x10d   : > { %790 = vst [vmem:[%s1206_s14 + $0x1d8] sm:$0xff] %v726_v62 }
 0x10e   : > { %743 = vst [vmem:[%s1206_s14 + $0x60] sm:$0xff] %v679_v63 }
 0x10f   : > { %759 = vst [vmem:[%s1206_s14 + $0xe0] sm:$0xff] %v695_v0  ;;  %v617_v1 = vpop.f32.mrf.mxu2  ;;  %v657_v2 = vpop.f32.mrf.mxu3 }
 0x110   : > { %v618_v3 = vadd.f32 %v1198_v40, %v617_v1  ;;  %v658_v4 = vadd.f32 %v1198_v40, %v657_v2  ;;  %v539_v5 = vpop.f32.mrf.mxu0  ;;  %v579_v6 = vpop.f32.mrf.mxu1 }
 0x111   : > { %v540_v7 = vadd.f32 %v1198_v40, %v539_v5  ;;  %v580_v8 = vadd.f32 %v1198_v40, %v579_v6 }
 0x112   : > { %v711_v9 = vmax.f32 %v618_v3, 0.0  ;;  %v727_v10 = vmax.f32 %v658_v4, 0.0 }
 0x113   : > { %v680_v11 = vmax.f32 %v540_v7, 0.0  ;;  %v696_v12 = vmax.f32 %v580_v8, 0.0 }
 0x114   : > { %775 = vst [vmem:[%s1206_s14 + $0x160] sm:$0xff] %v711_v9 }
 0x115   : > { %791 = vst [vmem:[%s1206_s14 + $0x1e0] sm:$0xff] %v727_v10 }
 0x116   : > { %744 = vst [vmem:[%s1206_s14 + $0x68] sm:$0xff] %v680_v11 }
 0x117   : > { %760 = vst [vmem:[%s1206_s14 + $0xe8] sm:$0xff] %v696_v12  ;;  %v619_v13 = vpop.f32.mrf.mxu2  ;;  %v659_v14 = vpop.f32.mrf.mxu3 }
 0x118   : > { %v620_v15 = vadd.f32 %v1198_v40, %v619_v13  ;;  %v660_v16 = vadd.f32 %v1198_v40, %v659_v14  ;;  %v542_v17 = vpop.f32.mrf.mxu0  ;;  %v582_v18 = vpop.f32.mrf.mxu1 }
 0x119   : > { %v543_v19 = vadd.f32 %v1198_v40, %v542_v17  ;;  %v583_v20 = vadd.f32 %v1198_v40, %v582_v18 }
 0x11a   : > { %v712_v21 = vmax.f32 %v620_v15, 0.0  ;;  %v728_v22 = vmax.f32 %v660_v16, 0.0 }
 0x11b   : > { %v681_v23 = vmax.f32 %v543_v19, 0.0  ;;  %v697_v24 = vmax.f32 %v583_v20, 0.0 }
 0x11c   : > { %776 = vst [vmem:[%s1206_s14 + $0x168] sm:$0xff] %v712_v21 }
 0x11d   : > { %792 = vst [vmem:[%s1206_s14 + $0x1e8] sm:$0xff] %v728_v22 }
 0x11e   : > { %745 = vst [vmem:[%s1206_s14 + $0x70] sm:$0xff] %v681_v23 }
 0x11f   : > { %761 = vst [vmem:[%s1206_s14 + $0xf0] sm:$0xff] %v697_v24  ;;  %v622_v25 = vpop.f32.mrf.mxu2  ;;  %v662_v26 = vpop.f32.mrf.mxu3 }
 0x120   : > { %v623_v27 = vadd.f32 %v1198_v40, %v622_v25  ;;  %v663_v28 = vadd.f32 %v1198_v40, %v662_v26  ;;  %v544_v29 = vpop.f32.mrf.mxu0  ;;  %v584_v30 = vpop.f32.mrf.mxu1 }
 0x121   : > { %v545_v31 = vadd.f32 %v1198_v40, %v544_v29  ;;  %v585_v32 = vadd.f32 %v1198_v40, %v584_v30 }
 0x122   : > { %v713_v33 = vmax.f32 %v623_v27, 0.0  ;;  %v729_v34 = vmax.f32 %v663_v28, 0.0 }
 0x123   : > { %v682_v35 = vmax.f32 %v545_v31, 0.0  ;;  %v698_v36 = vmax.f32 %v585_v32, 0.0 }
 0x124   : > { %777 = vst [vmem:[%s1206_s14 + $0x170] sm:$0xff] %v713_v33 }
 0x125   : > { %793 = vst [vmem:[%s1206_s14 + $0x1f0] sm:$0xff] %v729_v34 }
 0x126   : > { %746 = vst [vmem:[%s1206_s14 + $0x78] sm:$0xff] %v682_v35 }
 0x127   : > { %762 = vst [vmem:[%s1206_s14 + $0xf8] sm:$0xff] %v698_v36  ;;  %v624_v37 = vpop.f32.mrf.mxu2  ;;  %v664_v38 = vpop.f32.mrf.mxu3 }
 0x128   : > { %v625_v39 = vadd.f32 %v1198_v40, %v624_v37  ;;  %v665_v41 = vadd.f32 %v1198_v40, %v664_v38 }
 0x12a   : > { %v714_v42 = vmax.f32 %v625_v39, 0.0  ;;  %v730_v43 = vmax.f32 %v665_v41, 0.0 }
 0x12c   : > { %778 = vst [vmem:[%s1206_s14 + $0x178] sm:$0xff] %v714_v42 }
 0x12d   : > { %794 = vst [vmem:[%s1206_s14 + $0x1f8] sm:$0xff] %v730_v43 }
 0x12e PF: > { %s13_s12 = sadd.s32 1, %s1101_s12  }
 0x12f   : > { %p10_p4 = scmp.ge.s32.totalorder %s13_s12, 4  }
 0x131   :  { %12 = sbr.rel (!%p10_p4) target bundleno = 1 (0x1), region = 62 }

// kernel: forward.6
= control target key start
LH: loop header
LB: loop body
LE: loop exit
PB: predicated region body
PF: predicated region fallthrough
CT: control target
= control target key end

     0   :  { %s455_s1 = inlined_call_operand.vmem [shape: bf16[128,128], index: 1, kind: input, shape index: {}]   ;;  %s456_s2 = inlined_call_operand.vmem [shape: f32[1,128], index: 2, kind: input, shape index: {}]   ;;  %s457_s0 = inlined_call_operand.vmem [shape: bf16[128,128], index: 0, kind: input, shape index: {}]   ;;  %s458_s3 = inlined_call_operand.vmem [shape: f32[128,128], index: 3, kind: output, shape index: {}]  }
   0x1   :  { %v310_v0 = vld [vmem:[%s455_s1 + $0x38] sm:$0xff]  ;;  %v309_v1 = vld [vmem:[%s455_s1 + $0x30] sm:$0xff]  ;;  %v308_v2 = vld [vmem:[%s455_s1 + $0x28] sm:$0xff] }
   0x2   :  { %146 = vmatpush.bf16.msra.mxu0 %v310_v0  ;;  %311 = vmatpush.bf16.msra.mxu1 %v310_v0  ;;  %v307_v3 = vld [vmem:[%s455_s1 + $0x20] sm:$0xff]  ;;  %v306_v4 = vld [vmem:[%s455_s1 + $0x18] sm:$0xff]  ;;  %v305_v5 = vld [vmem:[%s455_s1 + $0x10] sm:$0xff] }
   0x3   :  { %312 = vmatpush.bf16.msra.mxu2 %v310_v0  ;;  %313 = vmatpush.bf16.msra.mxu3 %v310_v0  ;;  %v304_v6 = vld [vmem:[%s455_s1 + $0x8] sm:$0xff]  ;;  %v303_v7 = vld [vmem:[%s455_s1] sm:$0xff]  ;;  %v297_v9 = vld [vmem:[%s457_s0 + $0x10] sm:$0xff] }
   0x4   :  { %v295_v8 = vld [vmem:[%s457_s0] sm:$0xff]  ;;  %v301_v11 = vld [vmem:[%s457_s0 + $0x30] sm:$0xff]  ;;  %v296_v12 = vld [vmem:[%s457_s0 + $0x8] sm:$0xff] }
   0x5   :  { %v299_v10 = vld [vmem:[%s457_s0 + $0x20] sm:$0xff]  ;;  %v298_v13 = vld [vmem:[%s457_s0 + $0x18] sm:$0xff]  ;;  %v300_v14 = vld [vmem:[%s457_s0 + $0x28] sm:$0xff] }
   0x6   :  { %147 = vmatpush.bf16.msra.mxu0 %v309_v1  ;;  %314 = vmatpush.bf16.msra.mxu1 %v309_v1  ;;  %v302_v15 = vld [vmem:[%s457_s0 + $0x38] sm:$0xff]  ;;  %v335_v16 = vld [vmem:[%s456_s2] ss:$0 sm:$0xff] }
   0x7   :  { %315 = vmatpush.bf16.msra.mxu2 %v309_v1  ;;  %316 = vmatpush.bf16.msra.mxu3 %v309_v1 }
   0xa   :  { %148 = vmatpush.bf16.msra.mxu0 %v308_v2  ;;  %317 = vmatpush.bf16.msra.mxu1 %v308_v2 }
   0xb   :  { %318 = vmatpush.bf16.msra.mxu2 %v308_v2  ;;  %319 = vmatpush.bf16.msra.mxu3 %v308_v2 }
   0xe   :  { %149 = vmatpush.bf16.msra.mxu0 %v307_v3  ;;  %320 = vmatpush.bf16.msra.mxu1 %v307_v3 }
   0xf   :  { %321 = vmatpush.bf16.msra.mxu2 %v307_v3  ;;  %322 = vmatpush.bf16.msra.mxu3 %v307_v3 }
  0x12   :  { %150 = vmatpush.bf16.msra.mxu0 %v306_v4  ;;  %323 = vmatpush.bf16.msra.mxu1 %v306_v4 }
  0x13   :  { %324 = vmatpush.bf16.msra.mxu2 %v306_v4  ;;  %325 = vmatpush.bf16.msra.mxu3 %v306_v4 }
  0x16   :  { %151 = vmatpush.bf16.msra.mxu0 %v305_v5  ;;  %326 = vmatpush.bf16.msra.mxu1 %v305_v5 }
  0x17   :  { %327 = vmatpush.bf16.msra.mxu2 %v305_v5  ;;  %328 = vmatpush.bf16.msra.mxu3 %v305_v5 }
  0x1a   :  { %152 = vmatpush.bf16.msra.mxu0 %v304_v6  ;;  %329 = vmatpush.bf16.msra.mxu1 %v304_v6 }
  0x1b   :  { %330 = vmatpush.bf16.msra.mxu2 %v304_v6  ;;  %331 = vmatpush.bf16.msra.mxu3 %v304_v6 }
  0x1e   :  { %153 = vmatpush.bf16.msra.mxu0 %v303_v7  ;;  %332 = vmatpush.bf16.msra.mxu1 %v303_v7 }
  0x1f   :  { %333 = vmatpush.bf16.msra.mxu2 %v303_v7  ;;  %334 = vmatpush.bf16.msra.mxu3 %v303_v7 }
  0x21   :  { %154 = vmatmul.bf16.vlgmr.msra.gmra.mxu0 %v295_v8  ;;  %164 = vmatmul.bf16.vlgmr.msra.gmra.mxu1 %v297_v9 }
  0x22   :  { %174 = vmatmul.bf16.vlgmr.msra.gmra.mxu2 %v299_v10  ;;  %184 = vmatmul.bf16.vlgmr.msra.gmra.mxu3 %v301_v11 }
  0x31   :  { %159 = vmatmul.bf16.gmra.mxu0 %v296_v12  ;;  %169 = vmatmul.bf16.gmra.mxu1 %v298_v13 }
  0x32   :  { %179 = vmatmul.bf16.gmra.mxu2 %v300_v14  ;;  %189 = vmatmul.bf16.gmra.mxu3 %v302_v15 }
  0x9e   :  { %v155_v17 = vpop.f32.mrf.mxu0  ;;  %v165_v18 = vpop.f32.mrf.mxu1 }
  0x9f   :  { %v156_v19 = vadd.f32 %v335_v16, %v155_v17  ;;  %v166_v20 = vadd.f32 %v335_v16, %v165_v18 }
  0xa1   :  { %v195_v21 = vmax.f32 %v156_v19, 0.0  ;;  %v199_v22 = vmax.f32 %v166_v20, 0.0 }
  0xa3   :  { %211 = vst [vmem:[%s458_s3] sm:$0xff] %v195_v21 }
  0xa4   :  { %215 = vst [vmem:[%s458_s3 + $0x20] sm:$0xff] %v199_v22 }
  0xa5   :  { %v175_v23 = vpop.f32.mrf.mxu2  ;;  %v185_v24 = vpop.f32.mrf.mxu3 }
  0xa6   :  { %v176_v25 = vadd.f32 %v335_v16, %v175_v23  ;;  %v186_v26 = vadd.f32 %v335_v16, %v185_v24  ;;  %v157_v27 = vpop.f32.mrf.mxu0  ;;  %v167_v28 = vpop.f32.mrf.mxu1 }
  0xa7   :  { %v158_v29 = vadd.f32 %v335_v16, %v157_v27  ;;  %v168_v30 = vadd.f32 %v335_v16, %v167_v28 }
  0xa8   :  { %v203_v31 = vmax.f32 %v176_v25, 0.0  ;;  %v207_v32 = vmax.f32 %v186_v26, 0.0 }
  0xa9   :  { %v196_v33 = vmax.f32 %v158_v29, 0.0  ;;  %v200_v34 = vmax.f32 %v168_v30, 0.0 }
  0xaa   :  { %219 = vst [vmem:[%s458_s3 + $0x40] sm:$0xff] %v203_v31 }
  0xab   :  { %223 = vst [vmem:[%s458_s3 + $0x60] sm:$0xff] %v207_v32 }
  0xac   :  { %212 = vst [vmem:[%s458_s3 + $0x8] sm:$0xff] %v196_v33 }
  0xad   :  { %216 = vst [vmem:[%s458_s3 + $0x28] sm:$0xff] %v200_v34  ;;  %v177_v35 = vpop.f32.mrf.mxu2  ;;  %v187_v36 = vpop.f32.mrf.mxu3 }
  0xae   :  { %v178_v37 = vadd.f32 %v335_v16, %v177_v35  ;;  %v188_v38 = vadd.f32 %v335_v16, %v187_v36  ;;  %v160_v39 = vpop.f32.mrf.mxu0  ;;  %v170_v40 = vpop.f32.mrf.mxu1 }
  0xaf   :  { %v161_v41 = vadd.f32 %v335_v16, %v160_v39  ;;  %v171_v42 = vadd.f32 %v335_v16, %v170_v40 }
  0xb0   :  { %v204_v43 = vmax.f32 %v178_v37, 0.0  ;;  %v208_v44 = vmax.f32 %v188_v38, 0.0 }
  0xb1   :  { %v197_v45 = vmax.f32 %v161_v41, 0.0  ;;  %v201_v46 = vmax.f32 %v171_v42, 0.0 }
  0xb2   :  { %220 = vst [vmem:[%s458_s3 + $0x48] sm:$0xff] %v204_v43 }
  0xb3   :  { %224 = vst [vmem:[%s458_s3 + $0x68] sm:$0xff] %v208_v44 }
  0xb4   :  { %213 = vst [vmem:[%s458_s3 + $0x10] sm:$0xff] %v197_v45 }
  0xb5   :  { %217 = vst [vmem:[%s458_s3 + $0x30] sm:$0xff] %v201_v46  ;;  %v180_v47 = vpop.f32.mrf.mxu2  ;;  %v190_v48 = vpop.f32.mrf.mxu3 }
  0xb6   :  { %v181_v49 = vadd.f32 %v335_v16, %v180_v47  ;;  %v191_v50 = vadd.f32 %v335_v16, %v190_v48  ;;  %v162_v51 = vpop.f32.mrf.mxu0  ;;  %v172_v52 = vpop.f32.mrf.mxu1 }
  0xb7   :  { %v163_v53 = vadd.f32 %v335_v16, %v162_v51  ;;  %v173_v54 = vadd.f32 %v335_v16, %v172_v52 }
  0xb8   :  { %v205_v55 = vmax.f32 %v181_v49, 0.0  ;;  %v209_v56 = vmax.f32 %v191_v50, 0.0 }
  0xb9   :  { %v198_v57 = vmax.f32 %v163_v53, 0.0  ;;  %v202_v58 = vmax.f32 %v173_v54, 0.0 }
  0xba   :  { %221 = vst [vmem:[%s458_s3 + $0x50] sm:$0xff] %v205_v55 }
  0xbb   :  { %225 = vst [vmem:[%s458_s3 + $0x70] sm:$0xff] %v209_v56 }
  0xbc   :  { %214 = vst [vmem:[%s458_s3 + $0x18] sm:$0xff] %v198_v57 }
  0xbd   :  { %218 = vst [vmem:[%s458_s3 + $0x38] sm:$0xff] %v202_v58  ;;  %v182_v59 = vpop.f32.mrf.mxu2  ;;  %v192_v60 = vpop.f32.mrf.mxu3 }
  0xbe   :  { %v183_v61 = vadd.f32 %v335_v16, %v182_v59  ;;  %v193_v62 = vadd.f32 %v335_v16, %v192_v60 }
  0xc0   :  { %v206_v63 = vmax.f32 %v183_v61, 0.0  ;;  %v210_v0 = vmax.f32 %v193_v62, 0.0 }
  0xc2   :  { %222 = vst [vmem:[%s458_s3 + $0x58] sm:$0xff] %v206_v63 }
  0xc3   :  { %226 = vst [vmem:[%s458_s3 + $0x78] sm:$0xff] %v210_v0 }

// kernel: forward.7
= control target key start
LH: loop header
LB: loop body
LE: loop exit
PB: predicated region body
PF: predicated region fallthrough
CT: control target
= control target key end

     0   :  { %s374_s1 = inlined_call_operand.vmem [shape: bf16[256,128], index: 1, kind: input, shape index: {}]   ;;  %s375_s2 = inlined_call_operand.vmem [shape: f32[1,128], index: 2, kind: input, shape index: {}]   ;;  %s376_s0 = inlined_call_operand.vmem [shape: bf16[16,256], index: 0, kind: input, shape index: {}]   ;;  %s377_s3 = inlined_call_operand.vmem [shape: f32[16,128], index: 3, kind: output, shape index: {}]  }
   0x1   :  { %v275_v0 = vld [vmem:[%s374_s1 + $0x38] sm:$0xff]  ;;  %v274_v2 = vld [vmem:[%s374_s1 + $0x30] sm:$0xff]  ;;  %v273_v4 = vld [vmem:[%s374_s1 + $0x28] sm:$0xff] }
   0x2   :  { %v283_v1 = vld [vmem:[%s374_s1 + $0x78] sm:$0xff]  ;;  %158 = vmatpush.bf16.msra.mxu0 %v275_v0  ;;  %v282_v3 = vld [vmem:[%s374_s1 + $0x70] sm:$0xff]  ;;  %v281_v5 = vld [vmem:[%s374_s1 + $0x68] sm:$0xff] }
   0x3   :  { %172 = vmatpush.bf16.msra.mxu1 %v283_v1  ;;  %v272_v6 = vld [vmem:[%s374_s1 + $0x20] sm:$0xff]  ;;  %v271_v8 = vld [vmem:[%s374_s1 + $0x18] sm:$0xff]  ;;  %v270_v10 = vld [vmem:[%s374_s1 + $0x10] sm:$0xff] }
   0x4   :  { %v280_v7 = vld [vmem:[%s374_s1 + $0x60] sm:$0xff]  ;;  %v279_v9 = vld [vmem:[%s374_s1 + $0x58] sm:$0xff]  ;;  %v278_v11 = vld [vmem:[%s374_s1 + $0x50] sm:$0xff] }
   0x5   :  { %v269_v12 = vld [vmem:[%s374_s1 + $0x8] sm:$0xff]  ;;  %v268_v14 = vld [vmem:[%s374_s1] sm:$0xff] }
   0x6   :  { %159 = vmatpush.bf16.msra.mxu0 %v274_v2  ;;  %v277_v13 = vld [vmem:[%s374_s1 + $0x48] sm:$0xff]  ;;  %v276_v15 = vld [vmem:[%s374_s1 + $0x40] sm:$0xff] }
   0x7   :  { %173 = vmatpush.bf16.msra.mxu1 %v282_v3  ;;  %v196_v16 = vld [vmem:[%s376_s0] sm:$0xf]  ;;  %v267_v17 = vld [vmem:[%s376_s0 + $0x4] sm:$0xf0]  ;;  %v266_v18 = vld [vmem:[%s376_s0 + $0x4] sm:$0xf] }
   0x8   :  { %v198_v19 = vld [vmem:[%s376_s0 + $0x8] sm:$0xf0]  ;;  %v197_v20 = vor.u32 %v267_v17, %v196_v16  ;;  %v284_v22 = vld [vmem:[%s375_s2] ss:$0 sm:$0xff] }
   0x9   :  { %v201_v21 = vor.u32 %v266_v18, %v198_v19 }
   0xa   :  { %160 = vmatpush.bf16.msra.mxu0 %v273_v4 }
   0xb   :  { %174 = vmatpush.bf16.msra.mxu1 %v281_v5 }
   0xe   :  { %161 = vmatpush.bf16.msra.mxu0 %v272_v6 }
   0xf   :  { %175 = vmatpush.bf16.msra.mxu1 %v280_v7 }
  0x12   :  { %162 = vmatpush.bf16.msra.mxu0 %v271_v8 }
  0x13   :  { %176 = vmatpush.bf16.msra.mxu1 %v279_v9 }
  0x16   :  { %163 = vmatpush.bf16.msra.mxu0 %v270_v10 }
  0x17   :  { %177 = vmatpush.bf16.msra.mxu1 %v278_v11 }
  0x1a   :  { %164 = vmatpush.bf16.msra.mxu0 %v269_v12 }
  0x1b   :  { %178 = vmatpush.bf16.msra.mxu1 %v277_v13 }
  0x1e   :  { %165 = vmatpush.bf16.msra.mxu0 %v268_v14 }
  0x1f   :  { %179 = vmatpush.bf16.msra.mxu1 %v276_v15 }
  0x21   :  { %166 = vmatmul.bf16.vlgmr.msra.gmra.mxu0 %v197_v20 }
  0x22   :  { %180 = vmatmul.bf16.vlgmr.msra.gmra.mxu1 %v201_v21 }
  0x9e   :  { %v167_v23 = vpop.f32.mrf.mxu0 }
  0x9f   :  { %v181_v24 = vpop.f32.mrf.mxu1  ;;  %v168_v25 = vadd.f32 %v284_v22, %v167_v23 }
  0xa1   :  { %v182_v26 = vadd.f32 %v181_v24, %v168_v25 }
  0xa3   :  { %v186_v27 = vmax.f32 %v182_v26, 0.0 }
  0xa5   :  { %188 = vst [vmem:[%s377_s3] sm:$0xff] %v186_v27 }
  0xa6   :  { %v169_v28 = vpop.f32.mrf.mxu0 }
  0xa7   :  { %v170_v29 = vadd.f32 %v284_v22, %v169_v28  ;;  %v183_v30 = vpop.f32.mrf.mxu1 }
  0xa9   :  { %v184_v31 = vadd.f32 %v183_v30, %v170_v29 }
  0xab   :  { %v187_v32 = vmax.f32 %v184_v31, 0.0 }
  0xad   :  { %189 = vst [vmem:[%s377_s3 + $0x8] sm:$0xff] %v187_v32 }

// kernel: forward.9
= control target key start
LH: loop header
LB: loop body
LE: loop exit
PB: predicated region body
PF: predicated region fallthrough
CT: control target
= control target key end

     0   :  { %s218_s1 = inlined_call_operand.vmem [shape: bf16[128,128], index: 1, kind: input, shape index: {}]   ;;  %s219_s2 = inlined_call_operand.vmem [shape: f32[1,128], index: 2, kind: input, shape index: {}]   ;;  %s220_s0 = inlined_call_operand.vmem [shape: bf16[16,128], index: 0, kind: input, shape index: {}]   ;;  %s221_s3 = inlined_call_operand.vmem [shape: f32[16,128], index: 3, kind: output, shape index: {}]  }
   0x1   :  { %v156_v0 = vld [vmem:[%s218_s1 + $0x38] sm:$0xff]  ;;  %v155_v1 = vld [vmem:[%s218_s1 + $0x30] sm:$0xff]  ;;  %v154_v2 = vld [vmem:[%s218_s1 + $0x28] sm:$0xff] }
   0x2   :  { %90 = vmatpush.bf16.msra.mxu0 %v156_v0  ;;  %v153_v3 = vld [vmem:[%s218_s1 + $0x20] sm:$0xff]  ;;  %v152_v4 = vld [vmem:[%s218_s1 + $0x18] sm:$0xff]  ;;  %v151_v5 = vld [vmem:[%s218_s1 + $0x10] sm:$0xff] }
   0x3   :  { %v150_v6 = vld [vmem:[%s218_s1 + $0x8] sm:$0xff]  ;;  %v149_v7 = vld [vmem:[%s218_s1] sm:$0xff] }
   0x4   :  { %v148_v8 = vld [vmem:[%s220_s0] sm:$0xff] }
   0x5   :  { %v157_v9 = vld [vmem:[%s219_s2] ss:$0 sm:$0xff] }
   0x6   :  { %91 = vmatpush.bf16.msra.mxu0 %v155_v1 }
   0xa   :  { %92 = vmatpush.bf16.msra.mxu0 %v154_v2 }
   0xe   :  { %93 = vmatpush.bf16.msra.mxu0 %v153_v3 }
  0x12   :  { %94 = vmatpush.bf16.msra.mxu0 %v152_v4 }
  0x16   :  { %95 = vmatpush.bf16.msra.mxu0 %v151_v5 }
  0x1a   :  { %96 = vmatpush.bf16.msra.mxu0 %v150_v6 }
  0x1e   :  { %97 = vmatpush.bf16.msra.mxu0 %v149_v7 }
  0x21   :  { %98 = vmatmul.bf16.vlgmr.msra.gmra.mxu0 %v148_v8 }
  0x9e   :  { %v99_v10 = vpop.f32.mrf.mxu0 }
  0x9f   :  { %v100_v11 = vadd.f32 %v157_v9, %v99_v10 }
  0xa1   :  { %158 = vtanh.f32 %v100_v11 }
  0xa6   :  { %v101_v12 = vpop.f32.mrf.mxu0 }
  0xa7   :  { %v159_v13 = vpop.eup %158  ;;  %v102_v14 = vadd.f32 %v157_v9, %v101_v12 }
  0xa8   :  { %106 = vst [vmem:[%s221_s3] sm:$0xff] %v159_v13 }
  0xa9   :  { %160 = vtanh.f32 %v102_v14 }
  0xaf   :  { %v161_v15 = vpop.eup %160 }
  0xb0   :  { %107 = vst [vmem:[%s221_s3 + $0x8] sm:$0xff] %v161_v15 }

// kernel: forward.8
= control target key start
LH: loop header
LB: loop body
LE: loop exit
PB: predicated region body
PF: predicated region fallthrough
CT: control target
= control target key end

     0   :  { %s696_s1 = inlined_call_operand.vmem [shape: bf16[512,128], index: 1, kind: input, shape index: {}]   ;;  %s697_s2 = inlined_call_operand.vmem [shape: f32[1,128], index: 2, kind: input, shape index: {}]   ;;  %s698_s0 = inlined_call_operand.vmem [shape: bf16[16,512], index: 0, kind: input, shape index: {}]   ;;  %s699_s3 = inlined_call_operand.vmem [shape: f32[16,128], index: 3, kind: output, shape index: {}]  }
   0x1   :  { %v517_v0 = vld [vmem:[%s696_s1 + $0x38] sm:$0xff]  ;;  %v516_v4 = vld [vmem:[%s696_s1 + $0x30] sm:$0xff]  ;;  %v515_v8 = vld [vmem:[%s696_s1 + $0x28] sm:$0xff] }
   0x2   :  { %v525_v1 = vld [vmem:[%s696_s1 + $0x78] sm:$0xff]  ;;  %298 = vmatpush.bf16.msra.mxu0 %v517_v0  ;;  %v524_v5 = vld [vmem:[%s696_s1 + $0x70] sm:$0xff]  ;;  %v523_v9 = vld [vmem:[%s696_s1 + $0x68] sm:$0xff] }
   0x3   :  { %v533_v2 = vld [vmem:[%s696_s1 + $0xb8] sm:$0xff]  ;;  %312 = vmatpush.bf16.msra.mxu1 %v525_v1  ;;  %v532_v6 = vld [vmem:[%s696_s1 + $0xb0] sm:$0xff]  ;;  %v531_v10 = vld [vmem:[%s696_s1 + $0xa8] sm:$0xff] }
   0x4   :  { %v541_v3 = vld [vmem:[%s696_s1 + $0xf8] sm:$0xff]  ;;  %326 = vmatpush.bf16.msra.mxu2 %v533_v2  ;;  %v540_v7 = vld [vmem:[%s696_s1 + $0xf0] sm:$0xff]  ;;  %v539_v11 = vld [vmem:[%s696_s1 + $0xe8] sm:$0xff] }
   0x5   :  { %340 = vmatpush.bf16.msra.mxu3 %v541_v3  ;;  %v514_v12 = vld [vmem:[%s696_s1 + $0x20] sm:$0xff]  ;;  %v513_v16 = vld [vmem:[%s696_s1 + $0x18] sm:$0xff]  ;;  %v512_v20 = vld [vmem:[%s696_s1 + $0x10] sm:$0xff] }
   0x6   :  { %299 = vmatpush.bf16.msra.mxu0 %v516_v4  ;;  %v522_v13 = vld [vmem:[%s696_s1 + $0x60] sm:$0xff]  ;;  %v521_v17 = vld [vmem:[%s696_s1 + $0x58] sm:$0xff]  ;;  %v520_v21 = vld [vmem:[%s696_s1 + $0x50] sm:$0xff] }
   0x7   :  { %313 = vmatpush.bf16.msra.mxu1 %v524_v5  ;;  %v530_v14 = vld [vmem:[%s696_s1 + $0xa0] sm:$0xff]  ;;  %v529_v18 = vld [vmem:[%s696_s1 + $0x98] sm:$0xff]  ;;  %v528_v22 = vld [vmem:[%s696_s1 + $0x90] sm:$0xff] }
   0x8   :  { %327 = vmatpush.bf16.msra.mxu2 %v532_v6  ;;  %v538_v15 = vld [vmem:[%s696_s1 + $0xe0] sm:$0xff]  ;;  %v537_v19 = vld [vmem:[%s696_s1 + $0xd8] sm:$0xff]  ;;  %v536_v23 = vld [vmem:[%s696_s1 + $0xd0] sm:$0xff] }
   0x9   :  { %341 = vmatpush.bf16.msra.mxu3 %v540_v7  ;;  %v511_v24 = vld [vmem:[%s696_s1 + $0x8] sm:$0xff]  ;;  %v510_v28 = vld [vmem:[%s696_s1] sm:$0xff]  ;;  %v508_v33 = vld [vmem:[%s698_s0 + $0xc] sm:$0xf0] }
   0xa   :  { %300 = vmatpush.bf16.msra.mxu0 %v515_v8  ;;  %v519_v25 = vld [vmem:[%s696_s1 + $0x48] sm:$0xff]  ;;  %v518_v29 = vld [vmem:[%s696_s1 + $0x40] sm:$0xff]  ;;  %v366_v35 = vld [vmem:[%s698_s0 + $0x10] sm:$0xf0] }
   0xb   :  { %314 = vmatpush.bf16.msra.mxu1 %v523_v9  ;;  %v527_v26 = vld [vmem:[%s696_s1 + $0x88] sm:$0xff]  ;;  %v526_v30 = vld [vmem:[%s696_s1 + $0x80] sm:$0xff]  ;;  %v509_v37 = vld [vmem:[%s698_s0 + $0x14] sm:$0xf0] }
   0xc   :  { %328 = vmatpush.bf16.msra.mxu2 %v531_v10  ;;  %v535_v27 = vld [vmem:[%s696_s1 + $0xc8] sm:$0xff]  ;;  %v534_v31 = vld [vmem:[%s696_s1 + $0xc0] sm:$0xff]  ;;  %v374_v39 = vld [vmem:[%s698_s0 + $0x18] sm:$0xf0] }
   0xd   :  { %342 = vmatpush.bf16.msra.mxu3 %v539_v11  ;;  %v364_v32 = vld [vmem:[%s698_s0] sm:$0xf]  ;;  %v506_v34 = vld [vmem:[%s698_s0 + $0x4] sm:$0xf]  ;;  %v372_v36 = vld [vmem:[%s698_s0 + $0x8] sm:$0xf] }
   0xe   :  { %301 = vmatpush.bf16.msra.mxu0 %v514_v12  ;;  %v507_v38 = vld [vmem:[%s698_s0 + $0xc] sm:$0xf]  ;;  %v365_v40 = vor.u32 %v508_v33, %v364_v32  ;;  %v369_v41 = vor.u32 %v506_v34, %v366_v35  ;;  %v373_v42 = vor.u32 %v509_v37, %v372_v36  ;;  %v542_v44 = vld [vmem:[%s697_s2] ss:$0 sm:$0xff] }
   0xf   :  { %315 = vmatpush.bf16.msra.mxu1 %v522_v13  ;;  %v377_v43 = vor.u32 %v507_v38, %v374_v39 }
  0x10   :  { %329 = vmatpush.bf16.msra.mxu2 %v530_v14 }
  0x11   :  { %343 = vmatpush.bf16.msra.mxu3 %v538_v15 }
  0x12   :  { %302 = vmatpush.bf16.msra.mxu0 %v513_v16 }
  0x13   :  { %316 = vmatpush.bf16.msra.mxu1 %v521_v17 }
  0x14   :  { %330 = vmatpush.bf16.msra.mxu2 %v529_v18 }
  0x15   :  { %344 = vmatpush.bf16.msra.mxu3 %v537_v19 }
  0x16   :  { %303 = vmatpush.bf16.msra.mxu0 %v512_v20 }
  0x17   :  { %317 = vmatpush.bf16.msra.mxu1 %v520_v21 }
  0x18   :  { %331 = vmatpush.bf16.msra.mxu2 %v528_v22 }
  0x19   :  { %345 = vmatpush.bf16.msra.mxu3 %v536_v23 }
  0x1a   :  { %304 = vmatpush.bf16.msra.mxu0 %v511_v24 }
  0x1b   :  { %318 = vmatpush.bf16.msra.mxu1 %v519_v25 }
  0x1c   :  { %332 = vmatpush.bf16.msra.mxu2 %v527_v26 }
  0x1d   :  { %346 = vmatpush.bf16.msra.mxu3 %v535_v27 }
  0x1e   :  { %305 = vmatpush.bf16.msra.mxu0 %v510_v28 }
  0x1f   :  { %319 = vmatpush.bf16.msra.mxu1 %v518_v29 }
  0x20   :  { %333 = vmatpush.bf16.msra.mxu2 %v526_v30 }
  0x21   :  { %347 = vmatpush.bf16.msra.mxu3 %v534_v31  ;;  %306 = vmatmul.bf16.vlgmr.msra.gmra.mxu0 %v365_v40 }
  0x22   :  { %320 = vmatmul.bf16.vlgmr.msra.gmra.mxu1 %v369_v41 }
  0x23   :  { %334 = vmatmul.bf16.vlgmr.msra.gmra.mxu2 %v373_v42 }
  0x24   :  { %348 = vmatmul.bf16.vlgmr.msra.gmra.mxu3 %v377_v43 }
  0x9e   :  { %v307_v45 = vpop.f32.mrf.mxu0 }
  0x9f   :  { %v308_v46 = vadd.f32 %v542_v44, %v307_v45  ;;  %v321_v47 = vpop.f32.mrf.mxu1 }
  0xa1   :  { %v322_v48 = vadd.f32 %v321_v47, %v308_v46 }
  0xa6   :  { %v335_v49 = vpop.f32.mrf.mxu2  ;;  %v309_v52 = vpop.f32.mrf.mxu0 }
  0xa7   :  { %v349_v50 = vpop.f32.mrf.mxu3  ;;  %v336_v51 = vadd.f32 %v335_v49, %v322_v48  ;;  %v310_v54 = vadd.f32 %v542_v44, %v309_v52  ;;  %v323_v55 = vpop.f32.mrf.mxu1 }
  0xa9   :  { %v350_v53 = vadd.f32 %v349_v50, %v336_v51  ;;  %v324_v56 = vadd.f32 %v323_v55, %v310_v54 }
  0xab   :  { %543 = vtanh.f32 %v350_v53 }
  0xae   :  { %v337_v57 = vpop.f32.mrf.mxu2 }
  0xaf   :  { %v338_v58 = vadd.f32 %v337_v57, %v324_v56  ;;  %v351_v59 = vpop.f32.mrf.mxu3 }
  0xb1   :  { %v544_v60 = vpop.eup %543  ;;  %v352_v61 = vadd.f32 %v351_v59, %v338_v58 }
  0xb2   :  { %356 = vst [vmem:[%s699_s3] sm:$0xff] %v544_v60 }
  0xb3   :  { %545 = vtanh.f32 %v352_v61 }
  0xb9   :  { %v546_v62 = vpop.eup %545 }
  0xba   :  { %357 = vst [vmem:[%s699_s3 + $0x8] sm:$0xff] %v546_v62 }

</bundles_post_ra>
